<compile_context>
chip_gen: v7x
topology: tpu7x:2x2x1
jax: 0.10.0
libtpu: 0.0.40
codegen_flags: <defaults>
</compile_context>

<pallas_src>
import functools

import jax
import jax.numpy as jnp
from jax.experimental import pallas as pl
from jax.experimental.pallas import tpu as pltpu

_LANES = 128
_SUBLANES = 8


def _round_up(n, m):
    return ((n + m - 1) // m) * m


def _cdiv(a, b):
    return (a + b - 1) // b


def _mlp_kernel(v_ref, w1_ref, b1_ref, w2_ref, b2_ref, out_ref):
    """Linear -> ReLU -> Linear -> clamp(0, 1) on one (packed) row tile."""
    h = jnp.dot(v_ref[...], w1_ref[...],
                preferred_element_type=jnp.float32) + b1_ref[...]
    h = jnp.maximum(h, 0.0)                                      # ReLU
    y = jnp.dot(h.astype(w2_ref.dtype), w2_ref[...],
                preferred_element_type=jnp.float32) + b2_ref[...]
    out_ref[...] = jnp.clip(y, 0.0, 1.0).astype(out_ref.dtype)   # clamp(0, 1)


def _run_mlp(v, w1b, b1b, w2b, b2b, *, pack, lanes, tm):
    """Apply the fused MLP to one input array [N, C] via a row-tiled grid."""
    n, cin = v.shape
    comp_dtype = w1b.dtype
    feat = lanes // pack                       # features per logical row
    n_packed = _cdiv(n, pack)                  # packed (128-lane) rows

    # Tile selection:
    #   * at least ceil(n_packed / tm) tiles so each tile fits VMEM budget,
    #   * at least 2 tiles when two sublane-aligned tiles are possible
    #     (keeps both v7x TensorCores busy; no-op on v5e/v6e),
    #   * tiles split evenly to avoid a nearly-empty remainder tile.
    min_tiles = _cdiv(n_packed, tm)
    want_tiles = max(min_tiles, 2 if n_packed >= 2 * _SUBLANES else 1)
    tm_eff = _round_up(_cdiv(n_packed, want_tiles), _SUBLANES)
    grid = _cdiv(n_packed, tm_eff)
    n_rows_p = grid * tm_eff                   # padded packed rows
    n_pad = n_rows_p * pack                    # padded logical rows

    # Pad (rows to tile multiple, cols only in the non-packed fallback),
    # pack logical rows into 128-lane rows, cast matmul inputs to comp dtype.
    v_p = v
    if n_pad > n or feat > cin:
        v_p = jnp.pad(v, ((0, n_pad - n), (0, feat - cin)))
    v_p = v_p.reshape(n_rows_p, lanes).astype(comp_dtype)

    itemsize = jnp.dtype(comp_dtype).itemsize
    cost = pl.CostEstimate(
        flops=2 * 2 * n_rows_p * lanes * lanes,            # two matmuls
        transcendentals=0,
        bytes_accessed=(n_rows_p * lanes * itemsize        # row tiles in
                        + 2 * lanes * lanes * itemsize     # W1, W2
                        + 2 * lanes * 4                    # biases (f32)
                        + n_rows_p * lanes * 4))           # f32 output

    out = pl.pallas_call(
        _mlp_kernel,
        out_shape=jax.ShapeDtypeStruct((n_rows_p, lanes), jnp.float32),
        grid_spec=pltpu.PrefetchScalarGridSpec(
            num_scalar_prefetch=0,
            grid=(grid,),
            in_specs=[
                pl.BlockSpec((tm_eff, lanes), lambda i: (i, 0)),  # row tile (pipelined)
                pl.BlockSpec((lanes, lanes), lambda i: (0, 0)),   # W1 (VMEM-resident)
                pl.BlockSpec((1, lanes), lambda i: (0, 0)),       # b1 (VMEM-resident)
                pl.BlockSpec((lanes, lanes), lambda i: (0, 0)),   # W2 (VMEM-resident)
                pl.BlockSpec((1, lanes), lambda i: (0, 0)),       # b2 (VMEM-resident)
            ],
            out_specs=pl.BlockSpec((tm_eff, lanes), lambda i: (i, 0)),
        ),
        compiler_params=pltpu.CompilerParams(
            dimension_semantics=("parallel",)),   # shards row tiles across v7x TCs
        cost_estimate=cost,
    )(v_p, w1b, b1b, w2b, b2b)

    # Unpack: [n_rows_p, 128] -> [n_pad, feat]; drop pad rows (and pad cols in
    # the non-packed fallback).  In the packed path feat == cin (no col slice).
    return out.reshape(n_pad, feat)[:n, :cin]


@functools.partial(jax.jit, static_argnames=("use_bf16", "tm"))
def process_model_forward(adj_matrix, x, w1, b1, w2, b2, *,
                          use_bf16=True, tm=2048):
    """Fused Linear->ReLU->Linear->clamp applied to adj_matrix and x.

    adj_matrix: [Na, Cin], x: [Nx, Cin]  (float32)
    w1, w2: [Cout, Cin]; b1, b2: [Cout]  (PyTorch Linear layout)
    Returns (out_adj [Na, Cout], out_x [Nx, Cout]) in float32.
    """
    na, cin = adj_matrix.shape
    cout = w1.shape[0]
    assert x.shape[1] == cin
    assert w1.shape == (cout, cin)
    # torch composition linear_2(relu(linear(.))) implies in == out channels.
    assert w2.shape == (cout, cin) and cin == cout

    comp_dtype = jnp.bfloat16 if use_bf16 else jnp.float32

    if cin <= _LANES and _LANES % cin == 0:
        # Lane packing: PACK logical rows per 128-lane row, block-diagonal
        # 128x128 weights (PACK copies of W^T on the diagonal), biases tiled.
        pack = _LANES // cin
        lanes = _LANES
        eye = jnp.eye(pack, dtype=jnp.float32)
        w1b = jnp.kron(eye, w1.T).astype(comp_dtype)              # [128, 128]
        w2b = jnp.kron(eye, w2.T).astype(comp_dtype)              # [128, 128]
        b1b = jnp.tile(b1, pack).reshape(1, lanes).astype(jnp.float32)
        b2b = jnp.tile(b2, pack).reshape(1, lanes).astype(jnp.float32)
    else:
        # Fallback: zero-pad the feature axis to a multiple of 128 lanes.
        pack = 1
        lanes = _round_up(cin, _LANES)
        w1b = jnp.pad(w1.T, ((0, lanes - cin), (0, lanes - cout))).astype(comp_dtype)
        w2b = jnp.pad(w2.T, ((0, lanes - cin), (0, lanes - cout))).astype(comp_dtype)
        b1b = jnp.pad(b1, (0, lanes - cout)).reshape(1, lanes).astype(jnp.float32)
        b2b = jnp.pad(b2, (0, lanes - cout)).reshape(1, lanes).astype(jnp.float32)

    # One pallas_call per input: avoids the concat + row-split HBM round
    # trips; the (tiny) weights are simply re-DMA'd by the second call.
    out_adj = _run_mlp(adj_matrix, w1b, b1b, w2b, b2b,
                       pack=pack, lanes=lanes, tm=tm)
    out_x = _run_mlp(x, w1b, b1b, w2b, b2b,
                     pack=pack, lanes=lanes, tm=tm)
    return out_adj, out_x


def _init_linear_params(key, in_features, out_features):
    """Deterministic init mimicking torch.nn.Linear (uniform +/- 1/sqrt(in))."""
    kw, kb = jax.random.split(key)
    bound = 1.0 / jnp.sqrt(jnp.float32(in_features))
    w = jax.random.uniform(kw, (out_features, in_features), jnp.float32,
                           minval=-bound, maxval=bound)
    b = jax.random.uniform(kb, (out_features,), jnp.float32,
                           minval=-bound, maxval=bound)
    return w, b


if __name__ == "__main__":
    # in_channels must equal out_channels for linear_2(relu(linear(.))) to
    # compose, exactly as in the PyTorch module.
    in_channels = 32
    out_channels = 32
    num_nodes = 8

    key = jax.random.PRNGKey(0)
    k_adj, k_x, k_l1, k_l2 = jax.random.split(key, 4)

    adj_matrix = jax.random.uniform(k_adj, (num_nodes, in_channels), jnp.float32)
    x = jax.random.normal(k_x, (num_nodes, in_channels), jnp.float32)

    w1, b1 = _init_linear_params(k_l1, in_channels, out_channels)   # self.linear
    w2, b2 = _init_linear_params(k_l2, in_channels, out_channels)   # self.linear_2

    # Pure-JAX reference.
    def ref(v):
        h = jnp.maximum(v @ w1.T + b1, 0.0)
        return jnp.clip(h @ w2.T + b2, 0.0, 1.0)

    # f32 matmul path: exact vs reference.
    out_adj, out_x = process_model_forward(adj_matrix, x, w1, b1, w2, b2,
                                           use_bf16=False)
    jax.block_until_ready((out_adj, out_x))
    assert out_adj.shape == (num_nodes, out_channels)
    assert out_x.shape == (num_nodes, out_channels)
    assert jnp.allclose(out_adj, ref(adj_matrix), atol=1e-5)
    assert jnp.allclose(out_x, ref(x), atol=1e-5)

    # Default path: bf16 matmul inputs, f32 MXU accumulation (looser tolerance).
    out_adj_bf, out_x_bf = process_model_forward(adj_matrix, x, w1, b1, w2, b2)
    jax.block_until_ready((out_adj_bf, out_x_bf))
    assert jnp.allclose(out_adj_bf, ref(adj_matrix), atol=5e-2)
    assert jnp.allclose(out_x_bf, ref(x), atol=5e-2)

    print("KERNEL_OK")
</pallas_src>

<mosaic_0001>
module attributes {stable_mosaic.version = 11 : i64} {
  func.func @_mlp_kernel(%arg0: i32, %arg1: memref<8x128xf32, #tpu.memory_space<vmem>>, %arg2: memref<128x128xf32, #tpu.memory_space<vmem>>, %arg3: memref<1x128xf32, #tpu.memory_space<vmem>>, %arg4: memref<128x128xf32, #tpu.memory_space<vmem>>, %arg5: memref<1x128xf32, #tpu.memory_space<vmem>>, %arg6: memref<8x128xf32, #tpu.memory_space<vmem>>) attributes {dimension_semantics = [#tpu.dimension_semantics<parallel>], iteration_bounds = array<i64: 1>, scalar_prefetch = 0 : i64, scratch_operands = 0 : i64, tpu.core_type = #tpu.core_type<tc>, window_params = [{transform_indices = @transform_0, window_bounds = array<i64: 8, 128>}, {pipeline_mode = #tpu.pipeline_mode<synchronous>, transform_indices = @transform_1, window_bounds = array<i64: 128, 128>}, {pipeline_mode = #tpu.pipeline_mode<synchronous>, transform_indices = @transform_2, window_bounds = array<i64: 1, 128>}, {pipeline_mode = #tpu.pipeline_mode<synchronous>, transform_indices = @transform_3, window_bounds = array<i64: 128, 128>}, {pipeline_mode = #tpu.pipeline_mode<synchronous>, transform_indices = @transform_4, window_bounds = array<i64: 1, 128>}, {transform_indices = @transform_5, window_bounds = array<i64: 8, 128>}]} {
    %c0 = arith.constant 0 : index
    %c0_0 = arith.constant 0 : index
    %0 = vector.load %arg1[%c0, %c0_0] : memref<8x128xf32, #tpu.memory_space<vmem>>, vector<8x128xf32>
    %c0_1 = arith.constant 0 : index
    %c0_2 = arith.constant 0 : index
    %1 = vector.load %arg2[%c0_1, %c0_2] : memref<128x128xf32, #tpu.memory_space<vmem>>, vector<128x128xf32>
    %cst = arith.constant dense<0.000000e+00> : vector<8x128xf32>
    %2 = tpu.matmul %0, %1, %cst {dimension_numbers = #tpu.dot_dimension_numbers<[1], [0], [0], [1], [0, 0, 1, 1], [], []>} : vector<8x128xf32>, vector<128x128xf32>, vector<8x128xf32> -> vector<8x128xf32>
    %c0_3 = arith.constant 0 : index
    %c0_4 = arith.constant 0 : index
    %3 = vector.load %arg3[%c0_3, %c0_4] : memref<1x128xf32, #tpu.memory_space<vmem>>, vector<1x128xf32>
    %4 = vector.broadcast %3 : vector<1x128xf32> to vector<8x128xf32>
    %5 = arith.addf %2, %4 : vector<8x128xf32>
    %cst_5 = arith.constant 0.000000e+00 : f32
    %6 = vector.broadcast %cst_5 : f32 to vector<8x128xf32>
    %7 = arith.maximumf %5, %6 : vector<8x128xf32>
    %c0_6 = arith.constant 0 : index
    %c0_7 = arith.constant 0 : index
    %8 = vector.load %arg4[%c0_6, %c0_7] : memref<128x128xf32, #tpu.memory_space<vmem>>, vector<128x128xf32>
    %cst_8 = arith.constant dense<0.000000e+00> : vector<8x128xf32>
    %9 = tpu.matmul %7, %8, %cst_8 {dimension_numbers = #tpu.dot_dimension_numbers<[1], [0], [0], [1], [0, 0, 1, 1], [], []>} : vector<8x128xf32>, vector<128x128xf32>, vector<8x128xf32> -> vector<8x128xf32>
    %c0_9 = arith.constant 0 : index
    %c0_10 = arith.constant 0 : index
    %10 = vector.load %arg5[%c0_9, %c0_10] : memref<1x128xf32, #tpu.memory_space<vmem>>, vector<1x128xf32>
    %11 = vector.broadcast %10 : vector<1x128xf32> to vector<8x128xf32>
    %12 = arith.addf %9, %11 : vector<8x128xf32>
    %cst_11 = arith.constant 0.000000e+00 : f32
    %cst_12 = arith.constant 1.000000e+00 : f32
    %13 = vector.broadcast %cst_11 : f32 to vector<8x128xf32>
    %14 = arith.maximumf %13, %12 : vector<8x128xf32>
    %15 = vector.broadcast %cst_12 : f32 to vector<8x128xf32>
    %16 = arith.minimumf %15, %14 : vector<8x128xf32>
    %c0_13 = arith.constant 0 : index
    %c0_14 = arith.constant 0 : index
    %17 = vector.load %arg6[%c0_13, %c0_14] : memref<8x128xf32, #tpu.memory_space<vmem>>, vector<8x128xf32>
    tpu.vector_store %arg6[%c0_13, %c0_14], %16 {strides = array<i32>} : memref<8x128xf32, #tpu.memory_space<vmem>>, vector<8x128xf32>,
    return
  }
  func.func @transform_0(%arg0: i32) -> (i32, i32) {
    %c0_i32 = arith.constant 0 : i32
    %c0_i32_0 = arith.constant 0 : i32
    return %arg0, %c0_i32 : i32, i32
  }
  func.func @transform_1(%arg0: i32) -> (i32, i32) {
    %c0_i32 = arith.constant 0 : i32
    %c0_i32_0 = arith.constant 0 : i32
    %c0_i32_1 = arith.constant 0 : i32
    return %c0_i32, %c0_i32_0 : i32, i32
  }
  func.func @transform_2(%arg0: i32) -> (i32, i32) {
    %c0_i32 = arith.constant 0 : i32
    %c0_i32_0 = arith.constant 0 : i32
    %c0_i32_1 = arith.constant 0 : i32
    return %c0_i32, %c0_i32_0 : i32, i32
  }
  func.func @transform_3(%arg0: i32) -> (i32, i32) {
    %c0_i32 = arith.constant 0 : i32
    %c0_i32_0 = arith.constant 0 : i32
    %c0_i32_1 = arith.constant 0 : i32
    return %c0_i32, %c0_i32_0 : i32, i32
  }
  func.func @transform_4(%arg0: i32) -> (i32, i32) {
    %c0_i32 = arith.constant 0 : i32
    %c0_i32_0 = arith.constant 0 : i32
    %c0_i32_1 = arith.constant 0 : i32
    return %c0_i32, %c0_i32_0 : i32, i32
  }
  func.func @transform_5(%arg0: i32) -> (i32, i32) {
    %c0_i32 = arith.constant 0 : i32
    %c0_i32_0 = arith.constant 0 : i32
    return %arg0, %c0_i32 : i32, i32
  }
}

</mosaic_0001>

<bundles_post_ra>
// kernel: tile.13
= control target key start
LH: loop header
LB: loop body
LE: loop exit
PB: predicated region body
PF: predicated region fallthrough
CT: control target
= control target key end

     0   :  { %s22_s0 = inlined_call_operand.vmem [shape: f32[32], index: 0, kind: input, shape index: {}]   ;;  %s23_s1 = inlined_call_operand.vmem [shape: f32[4,32], index: 1, kind: output, shape index: {}]  }
   0x1   :  { %v4_v0 = vld [vmem:[%s22_s0] ss:$0 sm:$0xff] }
   0x2   :  { %5 = vst [vmem:[%s23_s1] sm:$0xf] %v4_v0 }

// kernel: tile.14
= control target key start
LH: loop header
LB: loop body
LE: loop exit
PB: predicated region body
PF: predicated region fallthrough
CT: control target
= control target key end

     0   :  { %vm7_vm0 = vcmask 261120   ;;  %s37_s8 = smov 32   ;;  %s38_s9 = smov 64   ;;  %vm13_vm1 = vcmask 1048320   ;;  %vm19_vm2 = vcmask 785920   ;;  %vm25_vm3 = vcmask 523520   ;;  %s55_s0 = inlined_call_operand.vmem [shape: f32[4,32], index: 0, kind: input, shape index: {}]   ;;  %s56_s1 = inlined_call_operand.vmem [shape: f32[1,128], index: 1, kind: output, shape index: {}]  }
   0x1   :  { %v4_v0 = vld [vmem:[%s55_s0] sm:$0xf]  ;;  %s36_s0 = smov 96  }
   0x2   :  { %5 = vst [vmem:[#allocation1] sm:$0xf] %v4_v0 }
   0x9   :  { %v10_v1 = vld [vmem:[#allocation1 + $0x3] sm:$0x1]   ;;  %v22_v2 = vld [vmem:[#allocation1 + $0x1] sm:$0x1]   ;;  %v6_v3 = vld [vmem:[#allocation1] sm:$0x1]  }
   0xa   :  { %11 = vrot.lane.b32.xlu0 %v10_v1, %s36_s0  ;;  %23 = vrot.lane.b32.xlu1 %v22_v2, %s37_s8  ;;  %v16_v4 = vld [vmem:[#allocation1 + $0x2] sm:$0x1]   ;;  %8 = vst.msk [vmem:[#allocation0] sm:$0x1] %vm7_vm0, %v6_v3  }
   0xe   :  { %17 = vrot.lane.b32.xlu0 %v16_v4, %s38_s9 }
  0x7c   :  { %v12_v5 = vpop.permute.xlu0 %11   ;;  %v24_v6 = vpop.permute.xlu1 %23  }
  0x7d   :  { %14 = vst.msk [vmem:[#allocation0] sm:$0x1] %vm13_vm1, %v12_v5  }
  0x80   :  { %v18_v7 = vpop.permute.xlu0 %17  }
  0x81   :  { %20 = vst.msk [vmem:[#allocation0] sm:$0x1] %vm19_vm2, %v18_v7  }
  0x82   :  { %26 = vst.msk [vmem:[#allocation0] sm:$0x1] %vm25_vm3, %v24_v6  }
  0x89   :  { %v30_v8 = vld [vmem:[#allocation0] sm:$0x1] }
  0x8a   :  { %32 = vst [vmem:[%s56_s1] sm:$0x1] %v30_v8 }

// kernel: process_model_forward.3
= control target key start
LH: loop header
LB: loop body
LE: loop exit
PB: predicated region body
PF: predicated region fallthrough
CT: control target
= control target key end

     0   :  { %v372_v0 = vmov 0.0|0.0   ;;  %vm373_vm0 = vmmov 0   ;;  %v374_v4 = vmov 0.0   ;;  %s529_s1 = inlined_call_operand.vmem [shape: f32[128,128], index: 1, kind: input, shape index: {}]   ;;  %s530_s3 = inlined_call_operand.vmem [shape: f32[128,128], index: 3, kind: input, shape index: {}]   ;;  %s531_s0 = inlined_call_operand.vmem [shape: f32[8,128], index: 0, kind: input, shape index: {}]   ;;  %s532_s2 = inlined_call_operand.vmem [shape: f32[1,128], index: 2, kind: input, shape index: {}]   ;;  %s533_s4 = inlined_call_operand.vmem [shape: f32[1,128], index: 4, kind: input, shape index: {}]   ;;  %s534_s5 = inlined_call_operand.vmem [shape: f32[8,128], index: 5, kind: output, shape index: {}]  }
   0x1   :  { %321 = vmatprep.subr.bf16.mxu0 %v372_v0  ;;  %v21_v1 = vld [vmem:[%s529_s1] sm:$0xff]  ;;  %v22_v2 = vld [vmem:[%s529_s1 + $0x8] sm:$0xff]  ;;  %v23_v3 = vld [vmem:[%s529_s1 + $0x10] sm:$0xff]  ;;  %283 = vmatprep.mubr.msk.f32.mxu0 %vm373_vm0, %v374_v4 }
   0x2   :  { %v322_v5 = vpack.c.bf16 %v22_v2, %v21_v1  ;;  %v24_v6 = vld [vmem:[%s529_s1 + $0x18] sm:$0xff]  ;;  %345 = vmatprep.subr.bf16.mxu1 %v372_v0  ;;  %318 = vmatprep.mubr.msk.f32.mxu1 %vm373_vm0, %v374_v4  ;;  %v25_v8 = vld [vmem:[%s529_s1 + $0x20] sm:$0xff]  ;;  %v26_v9 = vld [vmem:[%s529_s1 + $0x28] sm:$0xff] }
   0x3   :  { %v325_v7 = vpack.c.bf16 %v24_v6, %v23_v3  ;;  %v115_v10 = vld [vmem:[%s530_s3] sm:$0xff]  ;;  %v116_v11 = vld [vmem:[%s530_s3 + $0x8] sm:$0xff]  ;;  %v117_v12 = vld [vmem:[%s530_s3 + $0x10] sm:$0xff]  ;;  %v328_v14 = vpack.c.bf16 %v26_v9, %v25_v8 }
   0x4   :  { %323 = vmatpush3.bf16.msra.mxu0 %v322_v5  ;;  %v118_v13 = vld [vmem:[%s530_s3 + $0x18] sm:$0xff]  ;;  %v346_v15 = vpack.c.bf16 %v116_v11, %v115_v10  ;;  %v27_v16 = vld [vmem:[%s529_s1 + $0x30] sm:$0xff]  ;;  %v119_v19 = vld [vmem:[%s530_s3 + $0x20] sm:$0xff] }
   0x5   :  { %324 = vmatprep.subr.bf16.mxu0 %v372_v0  ;;  %v28_v17 = vld [vmem:[%s529_s1 + $0x38] sm:$0xff]  ;;  %v349_v18 = vpack.c.bf16 %v118_v13, %v117_v12  ;;  %v120_v20 = vld [vmem:[%s530_s3 + $0x28] sm:$0xff]  ;;  %v29_v22 = vld [vmem:[%s529_s1 + $0x40] sm:$0xff] }
   0x6   :  { %347 = vmatpush3.bf16.msra.mxu1 %v346_v15  ;;  %v331_v21 = vpack.c.bf16 %v28_v17, %v27_v16  ;;  %v30_v23 = vld [vmem:[%s529_s1 + $0x48] sm:$0xff]  ;;  %v352_v24 = vpack.c.bf16 %v120_v20, %v119_v19  ;;  %v121_v25 = vld [vmem:[%s530_s3 + $0x30] sm:$0xff]  ;;  %v122_v26 = vld [vmem:[%s530_s3 + $0x38] sm:$0xff] }
   0x7   :  { %348 = vmatprep.subr.bf16.mxu1 %v372_v0  ;;  %v334_v27 = vpack.c.bf16 %v30_v23, %v29_v22  ;;  %v31_v28 = vld [vmem:[%s529_s1 + $0x50] sm:$0xff]  ;;  %v32_v29 = vld [vmem:[%s529_s1 + $0x58] sm:$0xff]  ;;  %v355_v30 = vpack.c.bf16 %v122_v26, %v121_v25  ;;  %v123_v31 = vld [vmem:[%s530_s3 + $0x40] sm:$0xff] }
   0x8   :  { %326 = vmatpush3.bf16.msra.mxu0 %v325_v7  ;;  %v124_v32 = vld [vmem:[%s530_s3 + $0x48] sm:$0xff]  ;;  %v337_v33 = vpack.c.bf16 %v32_v29, %v31_v28  ;;  %v33_v34 = vld [vmem:[%s529_s1 + $0x60] sm:$0xff]  ;;  %v125_v37 = vld [vmem:[%s530_s3 + $0x50] sm:$0xff] }
   0x9   :  { %327 = vmatprep.subr.bf16.mxu0 %v372_v0  ;;  %v34_v35 = vld [vmem:[%s529_s1 + $0x68] sm:$0xff]  ;;  %v358_v36 = vpack.c.bf16 %v124_v32, %v123_v31  ;;  %v126_v38 = vld [vmem:[%s530_s3 + $0x58] sm:$0xff]  ;;  %v35_v40 = vld [vmem:[%s529_s1 + $0x70] sm:$0xff] }
   0xa   :  { %350 = vmatpush3.bf16.msra.mxu1 %v349_v18  ;;  %v340_v39 = vpack.c.bf16 %v34_v35, %v33_v34  ;;  %v36_v41 = vld [vmem:[%s529_s1 + $0x78] sm:$0xff]  ;;  %v361_v42 = vpack.c.bf16 %v126_v38, %v125_v37  ;;  %v127_v43 = vld [vmem:[%s530_s3 + $0x60] sm:$0xff]  ;;  %v128_v44 = vld [vmem:[%s530_s3 + $0x68] sm:$0xff] }
   0xb   :  { %351 = vmatprep.subr.bf16.mxu1 %v372_v0  ;;  %v343_v45 = vpack.c.bf16 %v36_v41, %v35_v40  ;;  %v364_v46 = vpack.c.bf16 %v128_v44, %v127_v43  ;;  %v20_v47 = vld [vmem:[%s531_s0] sm:$0xff]  ;;  %v129_v48 = vld [vmem:[%s530_s3 + $0x70] sm:$0xff]  ;;  %v130_v49 = vld [vmem:[%s530_s3 + $0x78] sm:$0xff] }
   0xc   :  { %329 = vmatpush3.bf16.msra.mxu0 %v328_v14  ;;  %v367_v50 = vpack.c.bf16 %v130_v49, %v129_v48  ;;  %v215_v51 = vld [vmem:[%s532_s2] ss:$0 sm:$0xff] }
   0xd   :  { %330 = vmatprep.subr.bf16.mxu0 %v372_v0  ;;  %v216_v56 = vld [vmem:[%s533_s4] ss:$0 sm:$0xff] }
   0xe   :  { %353 = vmatpush3.bf16.msra.mxu1 %v352_v24 }
   0xf   :  { %354 = vmatprep.subr.bf16.mxu1 %v372_v0 }
  0x10   :  { %332 = vmatpush3.bf16.msra.mxu0 %v331_v21 }
  0x11   :  { %333 = vmatprep.subr.bf16.mxu0 %v372_v0 }
  0x12   :  { %356 = vmatpush3.bf16.msra.mxu1 %v355_v30 }
  0x13   :  { %357 = vmatprep.subr.bf16.mxu1 %v372_v0 }
  0x14   :  { %335 = vmatpush3.bf16.msra.mxu0 %v334_v27 }
  0x15   :  { %336 = vmatprep.subr.bf16.mxu0 %v372_v0 }
  0x16   :  { %359 = vmatpush3.bf16.msra.mxu1 %v358_v36 }
  0x17   :  { %360 = vmatprep.subr.bf16.mxu1 %v372_v0 }
  0x18   :  { %338 = vmatpush3.bf16.msra.mxu0 %v337_v33 }
  0x19   :  { %339 = vmatprep.subr.bf16.mxu0 %v372_v0 }
  0x1a   :  { %362 = vmatpush3.bf16.msra.mxu1 %v361_v42 }
  0x1b   :  { %363 = vmatprep.subr.bf16.mxu1 %v372_v0 }
  0x1c   :  { %341 = vmatpush3.bf16.msra.mxu0 %v340_v39 }
  0x1d   :  { %342 = vmatprep.subr.bf16.mxu0 %v372_v0 }
  0x1e   :  { %365 = vmatpush3.bf16.msra.mxu1 %v364_v46 }
  0x1f   :  { %366 = vmatprep.subr.bf16.mxu1 %v372_v0 }
  0x20   :  { %344 = vmatpush3.bf16.msra.mxu0 %v343_v45 }
  0x22   :  { %368 = vmatpush3.bf16.msra.mxu1 %v367_v50 }
  0x23   :  { %284 = vmatmul.mubr.f32.vlgmr.msra.gmra.mrb[0].mxu0 %v20_v47 }
  0xf6   :  { %v110_v52 = vpop.f32.mrb[0].mxu0 }
  0xf7   :  { %v111_v53 = vadd.f32 %v215_v51, %v110_v52  ;;  %v285_v54 = vpop.f32.mrb[1].mxu0 }
  0xf9   :  { %v114_v55 = vmax.f32 %v111_v53, 0.0 }
  0xfb   :  { %319 = vmatmul.mubr.f32.vlgmr.msra.gmra.mrb[0].mxu1 %v114_v55 }
 0x1ce   :  { %v204_v57 = vpop.f32.mrb[0].mxu1 }
 0x1cf   :  { %v205_v58 = vadd.f32 %v216_v56, %v204_v57  ;;  %v320_v59 = vpop.f32.mrb[1].mxu1 }
 0x1d1   :  { %v208_v60 = vmax.f32 %v205_v58, 0.0 }
 0x1d3   :  { %v209_v61 = vmin.f32 %v208_v60, 1.0 }
 0x1d5   :  { %210 = vst [vmem:[%s534_s5] sm:$0xff] %v209_v61 }

</bundles_post_ra>
